<compile_context>
chip_gen: v5e
topology: v5e:2x2
jax: 0.10.0
libtpu: 0.0.40
codegen_flags: <defaults>
</compile_context>

<pallas_src>
import jax
import jax.numpy as jnp
from jax.experimental import pallas as pl
from jax.experimental.pallas import tpu as pltpu

IN_RAW = 28 * 28      # 784 (contraction dim, left unpadded)
HID = 128
N_OUT = 10
N_PAD = 128           # lane-dense padded fc2 output width
NEG_BIG = -1e30       # "minus infinity" for padded logit columns


def mlp_kernel(x_ref, w1_ref, b1_ref, w2_ref, b2_ref, o_ref):
    # x_ref:  (TB, 784) f32       w1_ref: (784, 128) bf16   b1_ref: (1, 128) f32
    # w2_ref: (128, 128) bf16     b2_ref: (1, 128)  f32     o_ref:  (TB, 128) f32
    x = x_ref[...].astype(jnp.bfloat16)

    # fc1 + ReLU (bf16 MXU matmul, f32 accumulate; bias/ReLU in f32).
    h = jnp.dot(x, w1_ref[...], preferred_element_type=jnp.float32)
    h = jnp.maximum(h + b1_ref[...], 0.0)                      # (TB, 128) f32

    # fc2 on a clean 128-wide N tile.  Padded weight columns are zero and the
    # padded bias columns are -1e30, so padded logits are already ~-inf.
    logits = jnp.dot(h.astype(jnp.bfloat16), w2_ref[...],
                     preferred_element_type=jnp.float32)
    logits = logits + b2_ref[...]                              # (TB, 128) f32

    # Numerically stable softmax over dim=1; reciprocal on the EUP.
    m = jnp.max(logits, axis=1, keepdims=True)
    e = jnp.exp(logits - m)                                    # padded cols -> 0
    denom = jnp.sum(e, axis=1, keepdims=True)
    o_ref[...] = (e * pl.reciprocal(denom, approx=True)).astype(o_ref.dtype)


def _round_up(a, m):
    return (a + m - 1) // m * m


def net_web_forward(x_nchw, w1, b1, w2, b2, *, tb_max=512):
    """x_nchw: (B, 1, 28, 28) f32 -> (B, 10) softmax probabilities (f32).

    w1: (784, 128), b1: (1, 128), w2: (128, 10), b2: (1, 10)  (weights stored
    (in, out), i.e. transposed relative to torch's nn.Linear).
    """
    B = x_nchw.shape[0]
    x2d = x_nchw.reshape(B, IN_RAW).astype(jnp.float32)        # view, no pad/cast pass

    # Adaptive batch tile: small batches -> one small tile; big batches -> 512-row tiles.
    tb = min(tb_max, _round_up(B, 8))
    Bp = _round_up(B, tb)
    if Bp != B:
        x2d = jnp.pad(x2d, ((0, Bp - B), (0, 0)))
    n_blocks = pl.cdiv(Bp, tb)

    # Weights are tiny; one-time bf16 cast / lane padding in the wrapper.
    w1_bf = w1.astype(jnp.bfloat16)                            # (784, 128)
    b1_f32 = b1.astype(jnp.float32)                            # (1, 128)
    w2_pad = jnp.pad(w2, ((0, 0), (0, N_PAD - N_OUT))).astype(jnp.bfloat16)
    b2_pad = jnp.pad(b2.astype(jnp.float32), ((0, 0), (0, N_PAD - N_OUT)),
                     constant_values=NEG_BIG)                  # padded cols ~ -inf

    out_full = pl.pallas_call(
        mlp_kernel,
        out_shape=jax.ShapeDtypeStruct((Bp, N_PAD), jnp.float32),
        grid_spec=pltpu.PrefetchScalarGridSpec(
            num_scalar_prefetch=0,
            grid=(n_blocks,),
            in_specs=[
                pl.BlockSpec((tb, IN_RAW), lambda i: (i, 0)),   # x tile (streamed)
                pl.BlockSpec((IN_RAW, HID), lambda i: (0, 0)),  # W1 (VMEM-resident)
                pl.BlockSpec((1, HID), lambda i: (0, 0)),       # b1 (resident)
                pl.BlockSpec((HID, N_PAD), lambda i: (0, 0)),   # W2 (resident)
                pl.BlockSpec((1, N_PAD), lambda i: (0, 0)),     # b2 (resident)
            ],
            out_specs=pl.BlockSpec((tb, N_PAD), lambda i: (i, 0)),
        ),
        compiler_params=pltpu.CompilerParams(
            dimension_semantics=("parallel",),
        ),
    )(x2d, w1_bf, b1_f32, w2_pad, b2_pad)

    return out_full[:B, :N_OUT]


def init_params(key):
    """Deterministic init mimicking nn.Linear defaults (uniform +/- 1/sqrt(fan_in))."""
    k1, k2, k3, k4 = jax.random.split(key, 4)
    bound1 = 1.0 / jnp.sqrt(784.0)
    bound2 = 1.0 / jnp.sqrt(128.0)
    w1 = jax.random.uniform(k1, (IN_RAW, HID), jnp.float32, -bound1, bound1)
    b1 = jax.random.uniform(k2, (1, HID), jnp.float32, -bound1, bound1)
    w2 = jax.random.uniform(k3, (HID, N_OUT), jnp.float32, -bound2, bound2)
    b2 = jax.random.uniform(k4, (1, N_OUT), jnp.float32, -bound2, bound2)
    return w1, b1, w2, b2


if __name__ == "__main__":
    key = jax.random.PRNGKey(0)
    kx, kp = jax.random.split(key)

    B = 8
    x = jax.random.normal(kx, (B, 1, 28, 28), jnp.float32)   # MNIST-like NCHW input
    w1, b1, w2, b2 = init_params(kp)

    out = net_web_forward(x, w1, b1, w2, b2)
    out = jax.block_until_ready(out)
    assert out.shape == (B, N_OUT)

    x2d = x.reshape(B, IN_RAW)

    # bf16-consistent reference (same dtype path as the kernel).
    h_bf = jnp.dot(x2d.astype(jnp.bfloat16), w1.astype(jnp.bfloat16),
                   preferred_element_type=jnp.float32) + b1
    h_bf = jnp.maximum(h_bf, 0.0)
    logits_bf = jnp.dot(h_bf.astype(jnp.bfloat16), w2.astype(jnp.bfloat16),
                        preferred_element_type=jnp.float32) + b2
    ref_bf = jax.nn.softmax(logits_bf, axis=1)

    # Full-f32 reference (PyTorch semantics).
    h_f32 = jnp.maximum(x2d @ w1 + b1, 0.0)
    ref_f32 = jax.nn.softmax(h_f32 @ w2 + b2, axis=1)

    assert jnp.allclose(out, ref_bf, atol=5e-3, rtol=5e-3)
    assert jnp.allclose(out, ref_f32, atol=3e-2, rtol=3e-2)
    assert jnp.allclose(jnp.sum(out, axis=1), 1.0, atol=1e-2)

    print("KERNEL_OK")
</pallas_src>

<mosaic_0001>
module attributes {stable_mosaic.version = 11 : i64} {
  func.func @mlp_kernel(%arg0: i32, %arg1: memref<8x784xf32, #tpu.memory_space<vmem>>, %arg2: memref<784x128xbf16, #tpu.memory_space<vmem>>, %arg3: memref<1x128xf32, #tpu.memory_space<vmem>>, %arg4: memref<128x128xbf16, #tpu.memory_space<vmem>>, %arg5: memref<1x128xf32, #tpu.memory_space<vmem>>, %arg6: memref<8x128xf32, #tpu.memory_space<vmem>>) attributes {dimension_semantics = [#tpu.dimension_semantics<parallel>], iteration_bounds = array<i64: 1>, scalar_prefetch = 0 : i64, scratch_operands = 0 : i64, tpu.core_type = #tpu.core_type<tc>, window_params = [{transform_indices = @transform_0, window_bounds = array<i64: 8, 784>}, {pipeline_mode = #tpu.pipeline_mode<synchronous>, transform_indices = @transform_1, window_bounds = array<i64: 784, 128>}, {pipeline_mode = #tpu.pipeline_mode<synchronous>, transform_indices = @transform_2, window_bounds = array<i64: 1, 128>}, {pipeline_mode = #tpu.pipeline_mode<synchronous>, transform_indices = @transform_3, window_bounds = array<i64: 128, 128>}, {pipeline_mode = #tpu.pipeline_mode<synchronous>, transform_indices = @transform_4, window_bounds = array<i64: 1, 128>}, {transform_indices = @transform_5, window_bounds = array<i64: 8, 128>}]} {
    %c0 = arith.constant 0 : index
    %c0_0 = arith.constant 0 : index
    %0 = vector.load %arg1[%c0, %c0_0] : memref<8x784xf32, #tpu.memory_space<vmem>>, vector<8x784xf32>
    %1 = arith.truncf %0 : vector<8x784xf32> to vector<8x784xbf16>
    %c0_1 = arith.constant 0 : index
    %c0_2 = arith.constant 0 : index
    %2 = vector.load %arg2[%c0_1, %c0_2] : memref<784x128xbf16, #tpu.memory_space<vmem>>, vector<784x128xbf16>
    %cst = arith.constant dense<0.000000e+00> : vector<8x128xf32>
    %3 = tpu.matmul %1, %2, %cst {dimension_numbers = #tpu.dot_dimension_numbers<[1], [0], [0], [1], [0, 0, 1, 1], [], []>} : vector<8x784xbf16>, vector<784x128xbf16>, vector<8x128xf32> -> vector<8x128xf32>
    %c0_3 = arith.constant 0 : index
    %c0_4 = arith.constant 0 : index
    %4 = vector.load %arg3[%c0_3, %c0_4] : memref<1x128xf32, #tpu.memory_space<vmem>>, vector<1x128xf32>
    %5 = vector.broadcast %4 : vector<1x128xf32> to vector<8x128xf32>
    %6 = arith.addf %3, %5 : vector<8x128xf32>
    %cst_5 = arith.constant 0.000000e+00 : f32
    %7 = vector.broadcast %cst_5 : f32 to vector<8x128xf32>
    %8 = arith.maximumf %6, %7 : vector<8x128xf32>
    %9 = arith.truncf %8 : vector<8x128xf32> to vector<8x128xbf16>
    %c0_6 = arith.constant 0 : index
    %c0_7 = arith.constant 0 : index
    %10 = vector.load %arg4[%c0_6, %c0_7] : memref<128x128xbf16, #tpu.memory_space<vmem>>, vector<128x128xbf16>
    %cst_8 = arith.constant dense<0.000000e+00> : vector<8x128xf32>
    %11 = tpu.matmul %9, %10, %cst_8 {dimension_numbers = #tpu.dot_dimension_numbers<[1], [0], [0], [1], [0, 0, 1, 1], [], []>} : vector<8x128xbf16>, vector<128x128xbf16>, vector<8x128xf32> -> vector<8x128xf32>
    %c0_9 = arith.constant 0 : index
    %c0_10 = arith.constant 0 : index
    %12 = vector.load %arg5[%c0_9, %c0_10] : memref<1x128xf32, #tpu.memory_space<vmem>>, vector<1x128xf32>
    %13 = vector.broadcast %12 : vector<1x128xf32> to vector<8x128xf32>
    %14 = arith.addf %11, %13 : vector<8x128xf32>
    %cst_11 = arith.constant dense<0xFF800000> : vector<8xf32>
    %15 = vector.multi_reduction <maximumf>, %14, %cst_11 [1] : vector<8x128xf32> to vector<8xf32>
    %16 = vector.shape_cast %15 : vector<8xf32> to vector<8x1xf32>
    %17 = vector.broadcast %16 : vector<8x1xf32> to vector<8x128xf32>
    %18 = arith.subf %14, %17 : vector<8x128xf32>
    %19 = math.exp %18 : vector<8x128xf32>
    %cst_12 = arith.constant dense<0.000000e+00> : vector<8xf32>
    %20 = vector.multi_reduction <add>, %19, %cst_12 [1] : vector<8x128xf32> to vector<8xf32>
    %21 = vector.shape_cast %20 : vector<8xf32> to vector<8x1xf32>
    %22 = tpu.reciprocal %21 {approx = true} : vector<8x1xf32> -> vector<8x1xf32>
    %23 = vector.broadcast %22 : vector<8x1xf32> to vector<8x128xf32>
    %24 = arith.mulf %19, %23 : vector<8x128xf32>
    %c0_13 = arith.constant 0 : index
    %c0_14 = arith.constant 0 : index
    %25 = vector.load %arg6[%c0_13, %c0_14] : memref<8x128xf32, #tpu.memory_space<vmem>>, vector<8x128xf32>
    tpu.vector_store %arg6[%c0_13, %c0_14], %24 {strides = array<i32>} : memref<8x128xf32, #tpu.memory_space<vmem>>, vector<8x128xf32>,
    return
  }
  func.func @transform_0(%arg0: i32) -> (i32, i32) {
    %c0_i32 = arith.constant 0 : i32
    %c0_i32_0 = arith.constant 0 : i32
    return %arg0, %c0_i32 : i32, i32
  }
  func.func @transform_1(%arg0: i32) -> (i32, i32) {
    %c0_i32 = arith.constant 0 : i32
    %c0_i32_0 = arith.constant 0 : i32
    %c0_i32_1 = arith.constant 0 : i32
    return %c0_i32, %c0_i32_0 : i32, i32
  }
  func.func @transform_2(%arg0: i32) -> (i32, i32) {
    %c0_i32 = arith.constant 0 : i32
    %c0_i32_0 = arith.constant 0 : i32
    %c0_i32_1 = arith.constant 0 : i32
    return %c0_i32, %c0_i32_0 : i32, i32
  }
  func.func @transform_3(%arg0: i32) -> (i32, i32) {
    %c0_i32 = arith.constant 0 : i32
    %c0_i32_0 = arith.constant 0 : i32
    %c0_i32_1 = arith.constant 0 : i32
    return %c0_i32, %c0_i32_0 : i32, i32
  }
  func.func @transform_4(%arg0: i32) -> (i32, i32) {
    %c0_i32 = arith.constant 0 : i32
    %c0_i32_0 = arith.constant 0 : i32
    %c0_i32_1 = arith.constant 0 : i32
    return %c0_i32, %c0_i32_0 : i32, i32
  }
  func.func @transform_5(%arg0: i32) -> (i32, i32) {
    %c0_i32 = arith.constant 0 : i32
    %c0_i32_0 = arith.constant 0 : i32
    return %arg0, %c0_i32 : i32, i32
  }
}

</mosaic_0001>

<bundles_post_ra>
// kernel: tpu_custom_call.1
= control target key start
LH: loop header
LB: loop body
LE: loop exit
PB: predicated region body
PF: predicated region fallthrough
CT: control target
= control target key end

     0   :  { %10 = vsyncpa [#allocation3], 0  ;;  %s1137_s0 = inlined_call_operand.hbm [shape: f32[8,784], index: 0, kind: input, shape index: {}]   ;;  %s1138_s1 = inlined_call_operand.hbm [shape: bf16[784,128], index: 1, kind: input, shape index: {}]   ;;  %s1139_s2 = inlined_call_operand.vmem [shape: f32[1,128], index: 2, kind: input, shape index: {}]   ;;  %s1140_s3 = inlined_call_operand.hbm [shape: bf16[128,128], index: 3, kind: input, shape index: {}]   ;;  %s1141_s4 = inlined_call_operand.vmem [shape: f32[1,128], index: 4, kind: input, shape index: {}]   ;;  %s1142_s5 = inlined_call_operand.hbm [shape: f32[8,128], index: 5, kind: output, shape index: {}]  }
   0x1   :  { %11 = vsyncpa [#allocation6], 0  ;;  %s28_s20 = sshll.u32 %s1138_s1, 4  ;;  %s29_s20 = int_to_ptr.hbm [resolvable:$true] %s28_s20 }
   0x2   :  { %12 = vsyncpa [#allocation4], 0  ;;  %s1083_s21 = smov [#allocation5]   ;;  %s18_s25 = sshll.u32 %s1137_s0, 4  ;;  %s19_s25 = int_to_ptr.hbm [resolvable:$true] %s18_s25 }
   0x3   :  { %s30_s22 = sshll.u32 %s1083_s21, 4  ;;  %s1084_s26 = smov 64   ;;  %s31_s22 = int_to_ptr.vmem [resolvable:$true] %s30_s22 }
   0x4   :  { %s1085_s27 = smov 4   ;;  %s1086_s28 = smov [#allocation2]  }
   0x5   :  { %36 = dma.hbm_to_vmem [thread:$0]  %s29_s20, 6272, %s31_s22, [#allocation6], %s1084_s26, %s1084_s26, %s1085_s27  }
   0x6   :  { %s20_s29 = sshll.u32 %s1086_s28, 4  ;;  %s43_s7 = sshll.u32 %s1140_s3, 4  ;;  %s21_s29 = int_to_ptr.vmem [resolvable:$true] %s20_s29  ;;  %s44_s7 = int_to_ptr.hbm [resolvable:$true] %s43_s7 }
   0x7   :  { %23 = dma.hbm_to_vmem [thread:$0]  %s19_s25, 896, %s21_s29, [#allocation3]  }
   0x8   :  { %s1087_s1 = smov [#allocation7]  }
   0x9   :  { %s45_s8 = sshll.u32 %s1087_s1, 4  ;;  %s46_s8 = int_to_ptr.vmem [resolvable:$true] %s45_s8 }
   0xa   :  { %51 = dma.hbm_to_vmem [thread:$0]  %s44_s7, 1024, %s46_s8, [#allocation6], %s1084_s26, %s1084_s26, %s1085_s27  }
   0xb   :  { %1077 = dma.done.wait [#allocation3], 896  }
   0xc   :  { %1078 = vsyncadd [#allocation3], 4294966400 }
   0xd   :  { %1079 = dma.done.wait [#allocation6], 7296  }
   0xe   :  { %1080 = vsyncadd [#allocation6], 4294960000  ;;  %v919_v0 = vld [vmem:[#allocation5 + $0x38] sm:$0xff]  ;;  %v918_v3 = vld [vmem:[#allocation5 + $0x30] sm:$0xff]  ;;  %vm477_vm0 = vcmask 130048   ;;  %s1088_s10 = smov [#allocation8]  }
   0xf   :  { %v927_v1 = vld [vmem:[#allocation5 + $0x78] sm:$0xff]  ;;  %481 = vmatpush.bf16.msra.mxu0 %v919_v0  ;;  %v926_v4 = vld [vmem:[#allocation5 + $0x70] sm:$0xff]  ;;  %v917_v8 = vld [vmem:[#allocation5 + $0x28] sm:$0xff]  ;;  %s670_s11 = sshll.u32 %s1088_s10, 4  ;;  %s672_s14 = sshll.u32 %s1142_s5, 4  ;;  %s671_s11 = int_to_ptr.vmem [resolvable:$true] %s670_s11  ;;  %s673_s14 = int_to_ptr.hbm [resolvable:$true] %s672_s14 }
  0x10   :  { %v935_v2 = vld [vmem:[#allocation5 + $0xb8] sm:$0xff]  ;;  %494 = vmatpush.bf16.msra.mxu1 %v927_v1  ;;  %v934_v5 = vld [vmem:[#allocation5 + $0xb0] sm:$0xff]  ;;  %v925_v9 = vld [vmem:[#allocation5 + $0x68] sm:$0xff] }
  0x11   :  { %507 = vmatpush.bf16.msra.mxu2 %v935_v2  ;;  %v943_v6 = vld [vmem:[#allocation5 + $0xf8] sm:$0xff]  ;;  %v942_v7 = vld [vmem:[#allocation5 + $0xf0] sm:$0xff]  ;;  %v933_v10 = vld [vmem:[#allocation5 + $0xa8] sm:$0xff] }
  0x12   :  { %520 = vmatpush.bf16.msra.mxu3 %v943_v6  ;;  %v941_v11 = vld [vmem:[#allocation5 + $0xe8] sm:$0xff]  ;;  %v916_v12 = vld [vmem:[#allocation5 + $0x20] sm:$0xff]  ;;  %v915_v16 = vld [vmem:[#allocation5 + $0x18] sm:$0xff] }
  0x13   :  { %482 = vmatpush.bf16.msra.mxu0 %v918_v3  ;;  %v924_v13 = vld [vmem:[#allocation5 + $0x60] sm:$0xff]  ;;  %v923_v17 = vld [vmem:[#allocation5 + $0x58] sm:$0xff]  ;;  %v914_v20 = vld [vmem:[#allocation5 + $0x10] sm:$0xff] }
  0x14   :  { %495 = vmatpush.bf16.msra.mxu1 %v926_v4  ;;  %v932_v14 = vld [vmem:[#allocation5 + $0xa0] sm:$0xff]  ;;  %v931_v18 = vld [vmem:[#allocation5 + $0x98] sm:$0xff]  ;;  %v922_v21 = vld [vmem:[#allocation5 + $0x50] sm:$0xff] }
  0x15   :  { %508 = vmatpush.bf16.msra.mxu2 %v934_v5  ;;  %v940_v15 = vld [vmem:[#allocation5 + $0xe0] sm:$0xff]  ;;  %v939_v19 = vld [vmem:[#allocation5 + $0xd8] sm:$0xff]  ;;  %v930_v22 = vld [vmem:[#allocation5 + $0x90] sm:$0xff] }
  0x16   :  { %521 = vmatpush.bf16.msra.mxu3 %v942_v7  ;;  %v938_v23 = vld [vmem:[#allocation5 + $0xd0] sm:$0xff]  ;;  %v913_v24 = vld [vmem:[#allocation5 + $0x8] sm:$0xff]  ;;  %v912_v27 = vld [vmem:[#allocation5] sm:$0xff] }
  0x17   :  { %483 = vmatpush.bf16.msra.mxu0 %v917_v8  ;;  %v921_v25 = vld [vmem:[#allocation5 + $0x48] sm:$0xff]  ;;  %v920_v29 = vld [vmem:[#allocation5 + $0x40] sm:$0xff]  ;;  %v68_v31 = vld [vmem:[#allocation2 + $0x8] sm:$0xff] }
  0x18   :  { %496 = vmatpush.bf16.msra.mxu1 %v925_v9  ;;  %v929_v26 = vld [vmem:[#allocation5 + $0x88] sm:$0xff]  ;;  %v951_v32 = vld [vmem:[#allocation5 + $0x138] sm:$0xff]  ;;  %v928_v34 = vld [vmem:[#allocation5 + $0x80] sm:$0xff]  ;;  %v75_v37 = vpack.c.bf16 %v68_v31, %v68_v31 }
  0x19   :  { %509 = vmatpush.bf16.msra.mxu2 %v933_v10  ;;  %v937_v28 = vld [vmem:[#allocation5 + $0xc8] sm:$0xff]  ;;  %v959_v33 = vld [vmem:[#allocation5 + $0x178] sm:$0xff]  ;;  %v936_v38 = vld [vmem:[#allocation5 + $0xc0] sm:$0xff] }
  0x1a   :  { %522 = vmatpush.bf16.msra.mxu3 %v941_v11  ;;  %v67_v30 = vld [vmem:[#allocation2] sm:$0xff]  ;;  %v69_v35 = vld [vmem:[#allocation2 + $0x10] sm:$0xff]  ;;  %v960_v39 = vld [vmem:[#allocation5 + $0x180] sm:$0xff] }
  0x1b   :  { %484 = vmatpush.bf16.msra.mxu0 %v916_v12  ;;  %v74_v36 = vpack.c.bf16 %v67_v30, %v67_v30  ;;  %v70_v40 = vld [vmem:[#allocation2 + $0x18] sm:$0xff]  ;;  %v950_v41 = vld [vmem:[#allocation5 + $0x130] sm:$0xff]  ;;  %v76_v43 = vpack.c.bf16 %v69_v35, %v69_v35  ;;  %v949_v45 = vld [vmem:[#allocation5 + $0x128] sm:$0xff] }
  0x1c   :  { %497 = vmatpush.bf16.msra.mxu1 %v924_v13  ;;  %v958_v42 = vld [vmem:[#allocation5 + $0x170] sm:$0xff]  ;;  %v77_v44 = vpack.c.bf16 %v70_v40, %v70_v40  ;;  %v957_v46 = vld [vmem:[#allocation5 + $0x168] sm:$0xff]  ;;  %v948_v47 = vld [vmem:[#allocation5 + $0x120] sm:$0xff] }
  0x1d   :  { %510 = vmatpush.bf16.msra.mxu2 %v932_v14  ;;  %v956_v48 = vld [vmem:[#allocation5 + $0x160] sm:$0xff]  ;;  %v947_v49 = vld [vmem:[#allocation5 + $0x118] sm:$0xff]  ;;  %v946_v52 = vld [vmem:[#allocation5 + $0x110] sm:$0xff] }
  0x1e   :  { %523 = vmatpush.bf16.msra.mxu3 %v940_v15  ;;  %v955_v50 = vld [vmem:[#allocation5 + $0x158] sm:$0xff]  ;;  %v954_v53 = vld [vmem:[#allocation5 + $0x150] sm:$0xff]  ;;  %v945_v55 = vld [vmem:[#allocation5 + $0x108] sm:$0xff] }
  0x1f   :  { %485 = vmatpush.bf16.msra.mxu0 %v915_v16  ;;  %v73_v51 = vld [vmem:[#allocation2 + $0x30] sm:$0xff]  ;;  %v953_v56 = vld [vmem:[#allocation5 + $0x148] sm:$0xff]  ;;  %v944_v57 = vld [vmem:[#allocation5 + $0x100] sm:$0xff] }
  0x20   :  { %498 = vmatpush.bf16.msra.mxu1 %v923_v17  ;;  %v80_v54 = vpack.c.bf16 %v73_v51, %v73_v51  ;;  %v952_v58 = vld [vmem:[#allocation5 + $0x140] sm:$0xff]  ;;  %v71_v59 = vld [vmem:[#allocation2 + $0x20] sm:$0xff]  ;;  %v72_v60 = vld [vmem:[#allocation2 + $0x28] sm:$0xff] }
  0x21   :  { %511 = vmatpush.bf16.msra.mxu2 %v931_v18  ;;  %v78_v61 = vpack.c.bf16 %v71_v59, %v71_v59  ;;  %v79_v62 = vpack.c.bf16 %v72_v60, %v72_v60  ;;  %v968_v63 = vld [vmem:[#allocation7 + $0x38] sm:$0xff]  ;;  %v967_v0 = vld [vmem:[#allocation7 + $0x30] sm:$0xff]  ;;  %v966_v1 = vld [vmem:[#allocation7 + $0x28] sm:$0xff] }
  0x22   :  { %524 = vmatpush.bf16.msra.mxu3 %v939_v19  ;;  %v965_v2 = vld [vmem:[#allocation7 + $0x20] sm:$0xff]  ;;  %v964_v3 = vld [vmem:[#allocation7 + $0x18] sm:$0xff]  ;;  %v963_v4 = vld [vmem:[#allocation7 + $0x10] sm:$0xff] }
  0x23   :  { %486 = vmatpush.bf16.msra.mxu0 %v914_v20  ;;  %v962_v5 = vld [vmem:[#allocation7 + $0x8] sm:$0xff]  ;;  %v961_v8 = vld [vmem:[#allocation7] sm:$0xff] }
  0x24   :  { %499 = vmatpush.bf16.msra.mxu1 %v922_v21  ;;  %v975_v13 = vld [vmem:[%s1139_s2] ss:$0 sm:$0xff] }
  0x25   :  { %512 = vmatpush.bf16.msra.mxu2 %v930_v22  ;;  %v976_v31 = vld [vmem:[%s1141_s4] ss:$0 sm:$0xff] }
  0x26   :  { %525 = vmatpush.bf16.msra.mxu3 %v938_v23 }
  0x27   :  { %487 = vmatpush.bf16.msra.mxu0 %v913_v24 }
  0x28   :  { %500 = vmatpush.bf16.msra.mxu1 %v921_v25 }
  0x29   :  { %513 = vmatpush.bf16.msra.mxu2 %v929_v26 }
  0x2a   :  { %526 = vmatpush.bf16.msra.mxu3 %v937_v28 }
  0x2b   :  { %488 = vmatpush.bf16.msra.mxu0 %v912_v27 }
  0x2c   :  { %501 = vmatpush.bf16.msra.mxu1 %v920_v29 }
  0x2d   :  { %514 = vmatpush.bf16.msra.mxu2 %v928_v34 }
  0x2e   :  { %489 = vmatmul.bf16.vlgmr.msra.gmra.mxu0 %v74_v36  ;;  %527 = vmatpush.bf16.msra.mxu3 %v936_v38 }
  0x2f   :  { %533 = vmatpush.bf16.msrb.mxu0 %v951_v32  ;;  %502 = vmatmul.bf16.vlgmr.msra.gmra.mxu1 %v75_v37 }
  0x30   :  { %546 = vmatpush.bf16.msrb.mxu1 %v959_v33  ;;  %515 = vmatmul.bf16.vlgmr.msra.gmra.mxu2 %v76_v43 }
  0x31   :  { %566 = vmatpush.bf16.msrb.mxu2 %v960_v39  ;;  %528 = vmatmul.bf16.vlgmr.msra.gmra.mxu3 %v77_v44 }
  0x32   :  { %642 = vmatpush.bf16.msrb.mxu3 %v968_v63 }
  0x33   :  { %534 = vmatpush.bf16.msrb.mxu0 %v950_v41 }
  0x34   :  { %547 = vmatpush.bf16.msrb.mxu1 %v958_v42 }
  0x36   :  { %643 = vmatpush.bf16.msrb.mxu3 %v967_v0 }
  0x37   :  { %535 = vmatpush.bf16.msrb.mxu0 %v949_v45 }
  0x38   :  { %548 = vmatpush.bf16.msrb.mxu1 %v957_v46 }
  0x3a   :  { %644 = vmatpush.bf16.msrb.mxu3 %v966_v1 }
  0x3b   :  { %536 = vmatpush.bf16.msrb.mxu0 %v948_v47 }
  0x3c   :  { %549 = vmatpush.bf16.msrb.mxu1 %v956_v48 }
  0x3e   :  { %645 = vmatpush.bf16.msrb.mxu3 %v965_v2 }
  0x3f   :  { %537 = vmatpush.bf16.msrb.mxu0 %v947_v49 }
  0x40   :  { %550 = vmatpush.bf16.msrb.mxu1 %v955_v50  ;;  %879 = vmatmul.msk.bf16.vlgmr.msrb.gmra.mxu2 %vm477_vm0, %v80_v54 }
  0x42   :  { %646 = vmatpush.bf16.msrb.mxu3 %v964_v3 }
  0x43   :  { %538 = vmatpush.bf16.msrb.mxu0 %v946_v52 }
  0x44   :  { %551 = vmatpush.bf16.msrb.mxu1 %v954_v53 }
  0x46   :  { %647 = vmatpush.bf16.msrb.mxu3 %v963_v4 }
  0x47   :  { %539 = vmatpush.bf16.msrb.mxu0 %v945_v55 }
  0x48   :  { %552 = vmatpush.bf16.msrb.mxu1 %v953_v56 }
  0x4a   :  { %648 = vmatpush.bf16.msrb.mxu3 %v962_v5 }
  0x4b   :  { %540 = vmatpush.bf16.msrb.mxu0 %v944_v57 }
  0x4c   :  { %553 = vmatpush.bf16.msrb.mxu1 %v952_v58 }
  0x4e   :  { %541 = vmatmul.bf16.vlgmr.msrb.gmra.mxu0 %v78_v61  ;;  %649 = vmatpush.bf16.msrb.mxu3 %v961_v8 }
  0x4f   :  { %554 = vmatmul.bf16.vlgmr.msrb.gmra.mxu1 %v79_v62 }
  0xab   :  { %v490_v6 = vpop.f32.mrf.mxu0 }
  0xac   :  { %v503_v7 = vpop.f32.mrf.mxu1  ;;  %v491_v14 = vadd.f32 %v975_v13, %v490_v6 }
  0xae   :  { %v504_v17 = vadd.f32 %v503_v7, %v491_v14 }
  0xb3   :  { %v492_v9 = vpop.f32.mrf.mxu0  ;;  %v516_v11 = vpop.f32.mrf.mxu2 }
  0xb4   :  { %v505_v10 = vpop.f32.mrf.mxu1  ;;  %v529_v12 = vpop.f32.mrf.mxu3  ;;  %v517_v18 = vadd.f32 %v516_v11, %v504_v17 }
  0xb6   :  { %v530_v20 = vadd.f32 %v529_v12, %v517_v18 }
  0xbb   :  { %v518_v15 = vpop.f32.mrf.mxu2 }
  0xbc   :  { %v531_v16 = vpop.f32.mrf.mxu3 }
  0xc3   :  { %v568_v19 = vpop.f32.mrf.mxu2 }
  0xcb   :  { %v542_v21 = vpop.f32.mrf.mxu0  ;;  %v570_v25 = vpop.f32.mrf.mxu2 }
  0xcc   :  { %v555_v22 = vpop.f32.mrf.mxu1  ;;  %v543_v23 = vadd.f32 %v542_v21, %v530_v20 }
  0xce   :  { %v556_v24 = vadd.f32 %v555_v22, %v543_v23 }
  0xd0   :  { %v569_v26 = vadd.f32 %v568_v19, %v556_v24 }
  0xd2   :  { %v572_v27 = vmax.f32 %v569_v26, 0.0 }
  0xd3   :  { %v544_v28 = vpop.f32.mrf.mxu0 }
  0xd4   :  { %v557_v29 = vpop.f32.mrf.mxu1  ;;  %v573_v30 = vpack.c.bf16 %v572_v27, %v572_v27 }
  0xd6   :  { %650 = vmatmul.bf16.vlgmr.msrb.gmra.mxu3 %v573_v30 }
 0x159   :  { %v651_v32 = vpop.f32.mrf.mxu3 }
 0x15a   :  { %v652_v33 = vadd.f32 %v976_v31, %v651_v32 }
 0x15c   :  { %655 = vmax.xlane.f32.xlu0 %v652_v33 }
 0x161   :  { %v653_v34 = vpop.f32.mrf.mxu3 }
 0x1cf   :  { %v656_v35 = vpop.xlane.xlu0 %655 }
 0x1d0   :  { %v657_v36 = vsub.f32 %v652_v33, %v656_v35 }
 0x1d2   :  { %v658_v37 = vmul.f32 1.442695, %v657_v36 }
 0x1d4   :  { %977 = vpow2.f32 %v658_v37 }
 0x1da   :  { %v978_v38 = vpop.eup %977 }
 0x1db   :  { %660 = vadd.xlane.f32.xlu0 %v978_v38 }
 0x24e   :  { %v661_v39 = vpop.xlane.xlu0 %660 }
 0x24f   :  { %979 = vrcp.f32 %v661_v39 }
 0x255   :  { %v980_v40 = vpop.eup %979 }
 0x256   :  { %v663_v41 = vmul.f32 %v980_v40, %v978_v38 }
 0x258   :  { %664 = vst [vmem:[#allocation8] sm:$0xff] %v663_v41 }
 0x259   :  { %675 = dma.vmem_to_hbm [thread:$0]  %s671_s11, 128, %s673_s14, [#allocation4]  }
 0x25a   :  { %1081 = dma.done.wait [#allocation4], 128  }
 0x25b   :  { %1082 = vsyncadd [#allocation4], 4294967168 }
 0x25c   :  { %680 = vsyncpa [#allocation3], 1 }
 0x25d   :  { %681 = vsyncpa [#allocation6], 1 }
 0x25e   :  { %682 = vsyncpa [#allocation4], 1 }

</bundles_post_ra>
